<compile_context>
chip_gen: v6e
topology: v6e:2x2x1
jax: 0.10.0
libtpu: 0.0.40
codegen_flags: <defaults>
</compile_context>

<pallas_src>
import functools
import math

import jax
import jax.numpy as jnp
from jax.experimental import pallas as pl
from jax.experimental.pallas import tpu as pltpu


def _round_up(x, m):
    return (x + m - 1) // m * m


_TARGET_OUT_BLOCK_BYTES = 2 << 20     # ~2 MiB output tile (double-buffered by Pallas)
_MAX_RESIDENT_TIME_ROWS = 16384       # resident time costs rows*512 B VMEM (lane pad)


def _pick_block_rows(total_rows, row_width, itemsize):
    """Rows per grid step: as large as the VMEM budget allows (big tiles beat the
    ~0.35us/step pipeline overhead), a multiple of 8 (f32 sublane tile), and --
    when there is enough work -- small enough to leave >= 2 parallel grid steps
    for the v7x megacore (2 TensorCores).  Returns (block_rows, padded_rows)."""
    budget = max(8, (_TARGET_OUT_BLOCK_BYTES // (row_width * itemsize)) // 8 * 8)
    rows8 = _round_up(total_rows, 8)
    if rows8 <= 8:
        return rows8, rows8
    block = min(budget, rows8)
    if block == rows8 and rows8 >= 16:
        block = _round_up(rows8 // 2, 8)   # keep >= 2 grid steps (v7x: 2 TCs)
    padded = _round_up(rows8, block)
    return block, padded


def _folded_kernel(time_ref, expand_ref, freq_ref, sinmask_ref, out_ref,
                   *, block_rows, time_resident):
    # time_ref   : (padded_rows, fold) f32 (resident) or (block_rows, fold) block
    # expand_ref : (fold, W) f32 one-hot "repeat each time value dim times"
    # freq_ref   : (1, W) f32, freq_lane[j] = f[(j % dim) % half]
    # sinmask_ref: (1, W) f32, 1.0 where (j % dim) < half (sin lane), else 0.0
    # out_ref    : (block_rows, W) block of the lane-folded (padded_rows, W) output
    if time_resident:
        row0 = pl.multiple_of(pl.program_id(0) * block_rows, block_rows)
        t = time_ref[pl.ds(row0, block_rows), :]                    # (TB, fold)
    else:
        t = time_ref[...]                                           # (TB, fold)
    # Spread each time value across its `dim` lanes on the (otherwise idle) MXU.
    # With a 0/1 matrix and HIGHEST precision this is exact (t * 1.0 + 0s).
    t_lanes = jnp.dot(t, expand_ref[...],
                      precision=jax.lax.Precision.HIGHEST,
                      preferred_element_type=jnp.float32)           # (TB, W)
    phase = t_lanes * freq_ref[...]                                 # (TB, W)
    # Exact sin/cos with a per-lane select.  (Computes both -> 2x EUP; the
    # sin(phase + pi/2*mask) variant halves EUP work but adds ~1e-4 abs error
    # for phases ~1e3, so we keep the exact form.)
    emb = jnp.where(sinmask_ref[...] > 0.5, jnp.sin(phase), jnp.cos(phase))
    out_ref[...] = emb.astype(out_ref.dtype)


def _split_kernel(time_ref, freq_ref, out_ref, *, block_rows, half_dim, time_resident):
    # time_ref: (padded_rows, 1) f32 (resident) or (block_rows, 1) block
    # freq_ref: (1, half) f32 resident;  out_ref: (block_rows, dim) block
    if time_resident:
        row0 = pl.multiple_of(pl.program_id(0) * block_rows, block_rows)
        t = time_ref[pl.ds(row0, block_rows), :]                    # (TB, 1)
    else:
        t = time_ref[...]                                           # (TB, 1)
    phase = t * freq_ref[...]                                       # (TB, half)
    out_ref[:, :half_dim] = jnp.sin(phase).astype(out_ref.dtype)    # two aligned
    out_ref[:, half_dim:] = jnp.cos(phase).astype(out_ref.dtype)    # stores, no concat


def sinusoidal_position_embeddings(time, dim, max_time=1000, out_dtype=jnp.float32):
    """Pallas equivalent of SinusoidalPositionEmbeddings(dim, max_time)(time)."""
    if dim % 2 != 0:
        raise ValueError(f"dim must be even, got dim={dim}")
    half = dim // 2

    orig_shape = time.shape
    # forward() is `self.embeddings[time.long()]`: truncate to integer and (like
    # torch indexing) let negative indices wrap to the end of the table.
    t_idx = time.reshape(-1).astype(jnp.int32)
    t_idx = jnp.where(t_idx < 0, t_idx + max_time, t_idx)
    # TODO(synk): indices outside [0, max_time) are not range-checked (the torch
    # table gather would raise); they just yield sin/cos of a larger phase.
    t_f32 = t_idx.astype(jnp.float32)
    n = t_f32.shape[0]

    # Hoisted frequency table.  The torch module hardcodes log(1000) (not
    # log(max_time)) -- keep that exactly.
    freqs = jnp.exp(jnp.arange(half, dtype=jnp.float32) * (-math.log(1000.0) / half))

    # Lane-folding factor: pack `fold` rows of width `dim` into one 128-lane row.
    fold = 128 // dim if (dim < 128 and 128 % dim == 0) else 1
    width = fold * dim
    itemsize = jnp.dtype(out_dtype).itemsize

    rows = pl.cdiv(n, fold)
    block_rows, padded_rows = _pick_block_rows(rows, width, itemsize)
    n_pad = padded_rows * fold
    t_padded = jnp.pad(t_f32, (0, n_pad - n))
    grid = (padded_rows // block_rows,)
    time_resident = padded_rows <= _MAX_RESIDENT_TIME_ROWS
    compiler_params = pltpu.CompilerParams(dimension_semantics=("parallel",))

    if fold > 1:
        lane = jnp.arange(width)
        e = lane % dim
        freq_lane = freqs[e % half][None, :]                          # (1, W)
        sin_mask = (e < half).astype(jnp.float32)[None, :]            # (1, W)
        expand = (lane[None, :] // dim ==
                  jnp.arange(fold)[:, None]).astype(jnp.float32)      # (fold, W)
        t_in = t_padded.reshape(padded_rows, fold)
        if time_resident:
            time_spec = pl.BlockSpec((padded_rows, fold), lambda i: (0, 0))
        else:
            time_spec = pl.BlockSpec((block_rows, fold), lambda i: (i, 0))

        out = pl.pallas_call(
            functools.partial(_folded_kernel, block_rows=block_rows,
                              time_resident=time_resident),
            out_shape=jax.ShapeDtypeStruct((padded_rows, width), out_dtype),
            grid_spec=pltpu.PrefetchScalarGridSpec(
                num_scalar_prefetch=0,
                grid=grid,
                in_specs=[
                    time_spec,
                    pl.BlockSpec((fold, width), lambda i: (0, 0)),    # resident
                    pl.BlockSpec((1, width), lambda i: (0, 0)),       # resident
                    pl.BlockSpec((1, width), lambda i: (0, 0)),       # resident
                ],
                out_specs=pl.BlockSpec((block_rows, width), lambda i: (i, 0)),
            ),
            compiler_params=compiler_params,
        )(t_in, expand, freq_lane, sin_mask)
        emb = out.reshape(n_pad, dim)          # free row-major un-fold
    else:
        t_in = t_padded.reshape(padded_rows, 1)
        freq_row = freqs[None, :]                                     # (1, half)
        if time_resident:
            time_spec = pl.BlockSpec((padded_rows, 1), lambda i: (0, 0))
        else:
            time_spec = pl.BlockSpec((block_rows, 1), lambda i: (i, 0))

        emb = pl.pallas_call(
            functools.partial(_split_kernel, block_rows=block_rows,
                              half_dim=half, time_resident=time_resident),
            out_shape=jax.ShapeDtypeStruct((padded_rows, dim), out_dtype),
            grid_spec=pltpu.PrefetchScalarGridSpec(
                num_scalar_prefetch=0,
                grid=grid,
                in_specs=[
                    time_spec,
                    pl.BlockSpec((1, half), lambda i: (0, 0)),        # resident
                ],
                out_specs=pl.BlockSpec((block_rows, dim), lambda i: (i, 0)),
            ),
            compiler_params=compiler_params,
        )(t_in, freq_row)

    return emb[:n].reshape(orig_shape + (dim,))


if __name__ == "__main__":
    key = jax.random.PRNGKey(0)
    max_time = 1000

    def torch_reference(time_idx, dim):
        # Build the table exactly like SinusoidalPositionEmbeddings.get_embeddings().
        half = dim // 2
        f = jnp.exp(jnp.arange(half, dtype=jnp.float32) * (-math.log(1000.0) / half))
        table = jnp.arange(max_time, dtype=jnp.float32)[:, None] * f[None, :]
        table = jnp.concatenate([jnp.sin(table), jnp.cos(table)], axis=-1)
        return table[time_idx]

    # (batch, dim): lane-folded small-dim path, split wide-dim path (ragged batch,
    # 2-step grid), folded path with a multi-step grid + padding.
    cases = [(8, 32), (10, 256), (300, 64)]
    for c, (B, dim) in enumerate(cases):
        k = jax.random.fold_in(key, c)
        time = jax.random.randint(k, (B,), 0, max_time, dtype=jnp.int32)
        out = jax.block_until_ready(sinusoidal_position_embeddings(time, dim, max_time))
        ref = torch_reference(time, dim)
        assert out.shape == (B, dim) and out.dtype == jnp.float32
        assert jnp.allclose(out, ref, atol=1e-5, rtol=1e-5), \
            (B, dim, float(jnp.max(jnp.abs(out - ref))))
    print("KERNEL_OK")
</pallas_src>

<mosaic_0001>
module attributes {stable_mosaic.version = 11 : i64} {
  func.func @_folded_kernel(%arg0: i32, %arg1: memref<8x4xf32, #tpu.memory_space<vmem>>, %arg2: memref<4x128xf32, #tpu.memory_space<vmem>>, %arg3: memref<1x128xf32, #tpu.memory_space<vmem>>, %arg4: memref<1x128xf32, #tpu.memory_space<vmem>>, %arg5: memref<8x128xf32, #tpu.memory_space<vmem>>) attributes {dimension_semantics = [#tpu.dimension_semantics<parallel>], iteration_bounds = array<i64: 1>, scalar_prefetch = 0 : i64, scratch_operands = 0 : i64, tpu.core_type = #tpu.core_type<tc>, window_params = [{pipeline_mode = #tpu.pipeline_mode<synchronous>, transform_indices = @transform_0, window_bounds = array<i64: 8, 4>}, {pipeline_mode = #tpu.pipeline_mode<synchronous>, transform_indices = @transform_1, window_bounds = array<i64: 4, 128>}, {pipeline_mode = #tpu.pipeline_mode<synchronous>, transform_indices = @transform_2, window_bounds = array<i64: 1, 128>}, {pipeline_mode = #tpu.pipeline_mode<synchronous>, transform_indices = @transform_3, window_bounds = array<i64: 1, 128>}, {transform_indices = @transform_4, window_bounds = array<i64: 8, 128>}]} {
    %c8_i32 = arith.constant 8 : i32
    %0 = arith.muli %arg0, %c8_i32 : i32
    %1 = tpu.assume_multiple %0, 8 : i32
    %2 = arith.index_cast %1 : i32 to index
    %c0 = arith.constant 0 : index
    %3 = vector.load %arg1[%2, %c0] : memref<8x4xf32, #tpu.memory_space<vmem>>, vector<8x4xf32>
    %c0_0 = arith.constant 0 : index
    %c0_1 = arith.constant 0 : index
    %4 = vector.load %arg2[%c0_0, %c0_1] : memref<4x128xf32, #tpu.memory_space<vmem>>, vector<4x128xf32>
    %cst = arith.constant dense<0.000000e+00> : vector<8x128xf32>
    %5 = tpu.matmul %3, %4, %cst {dimension_numbers = #tpu.dot_dimension_numbers<[1], [0], [0], [1], [0, 0, 1, 1], [], []>, precision = #tpu.contract_precision<fp32>} : vector<8x4xf32>, vector<4x128xf32>, vector<8x128xf32> -> vector<8x128xf32>
    %c0_2 = arith.constant 0 : index
    %c0_3 = arith.constant 0 : index
    %6 = vector.load %arg3[%c0_2, %c0_3] : memref<1x128xf32, #tpu.memory_space<vmem>>, vector<1x128xf32>
    %7 = vector.broadcast %6 : vector<1x128xf32> to vector<8x128xf32>
    %8 = arith.mulf %5, %7 : vector<8x128xf32>
    %c0_4 = arith.constant 0 : index
    %c0_5 = arith.constant 0 : index
    %9 = vector.load %arg4[%c0_4, %c0_5] : memref<1x128xf32, #tpu.memory_space<vmem>>, vector<1x128xf32>
    %cst_6 = arith.constant 5.000000e-01 : f32
    %10 = vector.broadcast %cst_6 : f32 to vector<1x128xf32>
    %11 = arith.cmpf ogt, %9, %10 : vector<1x128xf32>
    %12 = math.sin %8 : vector<8x128xf32>
    %13 = math.cos %8 : vector<8x128xf32>
    %14 = vector.shape_cast %11 : vector<1x128xi1> to vector<1x128xi1>
    %15 = vector.broadcast %14 : vector<1x128xi1> to vector<8x128xi1>
    %16 = arith.select %15, %12, %13 : vector<8x128xi1>, vector<8x128xf32>
    %c0_7 = arith.constant 0 : index
    %c0_8 = arith.constant 0 : index
    %17 = vector.load %arg5[%c0_7, %c0_8] : memref<8x128xf32, #tpu.memory_space<vmem>>, vector<8x128xf32>
    tpu.vector_store %arg5[%c0_7, %c0_8], %16 {strides = array<i32>} : memref<8x128xf32, #tpu.memory_space<vmem>>, vector<8x128xf32>,
    return
  }
  func.func @transform_0(%arg0: i32) -> (i32, i32) {
    %c0_i32 = arith.constant 0 : i32
    %c0_i32_0 = arith.constant 0 : i32
    %c0_i32_1 = arith.constant 0 : i32
    return %c0_i32, %c0_i32_0 : i32, i32
  }
  func.func @transform_1(%arg0: i32) -> (i32, i32) {
    %c0_i32 = arith.constant 0 : i32
    %c0_i32_0 = arith.constant 0 : i32
    %c0_i32_1 = arith.constant 0 : i32
    return %c0_i32, %c0_i32_0 : i32, i32
  }
  func.func @transform_2(%arg0: i32) -> (i32, i32) {
    %c0_i32 = arith.constant 0 : i32
    %c0_i32_0 = arith.constant 0 : i32
    %c0_i32_1 = arith.constant 0 : i32
    return %c0_i32, %c0_i32_0 : i32, i32
  }
  func.func @transform_3(%arg0: i32) -> (i32, i32) {
    %c0_i32 = arith.constant 0 : i32
    %c0_i32_0 = arith.constant 0 : i32
    %c0_i32_1 = arith.constant 0 : i32
    return %c0_i32, %c0_i32_0 : i32, i32
  }
  func.func @transform_4(%arg0: i32) -> (i32, i32) {
    %c0_i32 = arith.constant 0 : i32
    %c0_i32_0 = arith.constant 0 : i32
    return %arg0, %c0_i32 : i32, i32
  }
}

</mosaic_0001>

<bundles_post_ra>
// kernel: tpu_custom_call.1
= control target key start
LH: loop header
LB: loop body
LE: loop exit
PB: predicated region body
PF: predicated region fallthrough
CT: control target
= control target key end

     0   :  { %vm26_vm0 = vcmask 1043456   ;;  %v806_v2 = vmov 0.0   ;;  %vm807_vm1 = vmmov 0   ;;  %vm22_vm2 = vcmask 31744   ;;  %s884_s0 = inlined_call_operand.vmem [shape: f32[8,4], index: 0, kind: input, shape index: {}]   ;;  %s885_s1 = inlined_call_operand.vmem [shape: f32[4,128], index: 1, kind: input, shape index: {}]   ;;  %s886_s2 = inlined_call_operand.vmem [shape: f32[1,128], index: 2, kind: input, shape index: {}]   ;;  %s887_s3 = inlined_call_operand.vmem [shape: f32[1,128], index: 3, kind: input, shape index: {}]   ;;  %s888_s4 = inlined_call_operand.hbm [shape: f32[8,128], index: 4, kind: output, shape index: {}]  }
   0x1   :  { %v21_v0 = vld [vmem:[%s885_s1] sm:$0xf]  ;;  %736 = vmatprep.subr.mxu0 %v806_v2  ;;  %738 = vmatprep.mubr.msk.f32.mxu0 %vm807_vm1, %v806_v2 }
   0x2   :  { %v20_v1 = vld [vmem:[%s884_s0] sm:$0xff]  ;;  %v28_v3 = vsel %vm26_vm0, %v21_v0, 0 }
   0x3   :  { %9 = vsyncpa [#allocation3], 0  ;;  %v61_v4 = vand.u32 4294901760, %v28_v3  ;;  %741 = vmatprep.subr.mxu1 %v806_v2  ;;  %v24_v5 = vsel %vm22_vm2, %v20_v1, 0  ;;  %743 = vmatprep.mubr.msk.f32.mxu1 %vm807_vm1, %v806_v2  ;;  %v715_v29 = vld [vmem:[%s886_s2] ss:$0 sm:$0xff] }
   0x4   :  { %v96_v6 = vand.u32 4294901760, %v24_v5  ;;  %v808_v44 = vmov 683565275   ;;  %v809_v46 = vmov 2475754826  }
   0x5   :  { %737 = vmatpush3.msra.mxu0 %v61_v4  ;;  %v138_v7 = vsub.f32 %v28_v3, %v61_v4  ;;  %v810_v49 = vmov 2131351028   ;;  %v811_v52 = vmov 2102212464   ;;  %v812_v55 = vmov 920167782  }
   0x6   :  { %746 = vmatprep.subr.mxu0 %v806_v2  ;;  %v97_v8 = vsub.f32 %v24_v5, %v96_v6  ;;  %v813_v58 = vmov 1326507024  }
   0x7   :  { %v139_v9 = vand.u32 4294901760, %v138_v7 }
   0x8   :  { %v98_v10 = vand.u32 4294901760, %v97_v8 }
   0x9   :  { %v140_v11 = vsub.f32 %v138_v7, %v139_v9 }
   0xa   :  { %v99_v12 = vsub.f32 %v97_v8, %v98_v10 }
   0xb   :  { %v141_v13 = vand.u32 4294901760, %v140_v11 }
   0xc   :  { %v100_v14 = vand.u32 4294901760, %v99_v12 }
   0xd   :  { %742 = vmatpush3.msra.mxu1 %v141_v13 }
   0xe   :  { %739 = vmatmul.mubr.f32.vlgmr.msra.gmra.mxu0 %v100_v14  ;;  %744 = vmatmul.mubr.f32.vlgmr.msra.gmra.mxu1 %v96_v6 }
   0xf   :  { %747 = vmatpush3.msra.mxu0 %v138_v7  ;;  %751 = vmatprep.subr.mxu1 %v806_v2 }
  0x10   :  { %752 = vmatpush3.msra.mxu1 %v61_v4  ;;  %748 = vmatprep.mubr.msk.f32.mxu0 %vm807_vm1, %v806_v2 }
  0x11   :  { %756 = vmatprep.subr.mxu0 %v806_v2  ;;  %753 = vmatprep.mubr.msk.f32.mxu1 %vm807_vm1, %v806_v2 }
  0x12   :  { %749 = vmatmul.mubr.f32.vlgmr.msra.gmra.mxu0 %v97_v8  ;;  %754 = vmatmul.mubr.f32.vlgmr.msra.gmra.mxu1 %v98_v10 }
  0x13   :  { %757 = vmatpush3.msra.mxu0 %v139_v9  ;;  %761 = vmatprep.subr.mxu1 %v806_v2 }
  0x14   :  { %762 = vmatpush3.msra.mxu1 %v61_v4  ;;  %758 = vmatprep.mubr.msk.f32.mxu0 %vm807_vm1, %v806_v2 }
  0x15   :  { %763 = vmatprep.mubr.msk.f32.mxu1 %vm807_vm1, %v806_v2 }
  0x16   :  { %759 = vmatmul.mubr.f32.vlgmr.msra.gmra.mxu0 %v96_v6  ;;  %764 = vmatmul.mubr.f32.vlgmr.msra.gmra.mxu1 %v96_v6 }
  0xce   :  { %v102_v15 = vpop.f32.mrf.mxu0  ;;  %v178_v16 = vpop.f32.mrf.mxu1 }
  0xcf   :  { %v179_v17 = vadd.f32 %v178_v16, %v102_v15 }
  0xd0   :  { %v740_v18 = vpop.f32.mrf.mxu0  ;;  %v745_v19 = vpop.f32.mrf.mxu1 }
  0xd2   :  { %v252_v20 = vpop.f32.mrf.mxu0  ;;  %v326_v21 = vpop.f32.mrf.mxu1 }
  0xd3   :  { %v253_v22 = vadd.f32 %v252_v20, %v179_v17 }
  0xd4   :  { %v750_v23 = vpop.f32.mrf.mxu0  ;;  %v755_v24 = vpop.f32.mrf.mxu1 }
  0xd5   :  { %v327_v25 = vadd.f32 %v326_v21, %v253_v22 }
  0xd6   :  { %v400_v26 = vpop.f32.mrf.mxu0  ;;  %v472_v27 = vpop.f32.mrf.mxu1 }
  0xd7   :  { %v401_v28 = vadd.f32 %v400_v26, %v327_v25 }
  0xd8   :  { %v760_v30 = vpop.f32.mrf.mxu0  ;;  %v765_v31 = vpop.f32.mrf.mxu1 }
  0xd9   :  { %v473_v32 = vadd.f32 %v472_v27, %v401_v28 }
  0xdb   :  { %v856_v33 = vmul.f32 %v715_v29, %v473_v32 }
  0xdd   :  { %v489_v34 = vand.u32 2139095040, %v856_v33  ;;  %v486_v38 = vand.u32 2147483647, %v856_v33  ;;  %vm488_vm10 = vcmp.lt.s32.totalorder %v856_v33, 0 }
  0xdf   :  { %v490_v35 = vshrl.u32 %v489_v34, 23  ;;  %v493_v41 = vand.u32 8388607, %v486_v38  ;;  %vm487_vm11 = vcmp.le.f32.partialorder %v486_v38, 0.7853982 }
  0xe1   :  { %v716_v36 = vadd.s32 4294967169, %v490_v35  ;;  %v494_v60 = vor.u32 8388608, %v493_v41 }
  0xe3   :  { %v496_v37 = vadd.s32 1, %v716_v36  ;;  %v534_v10 = vshll.u32 %v494_v60, 8 }
  0xe5   :  { %vm497_vm3 = vcmp.gt.s32.totalorder %v496_v37, 0 }
  0xe6   :  { %v498_v39 = vsel %vm497_vm3, %v496_v37, 0 }
  0xe7   :  { %v500_v40 = vand.u32 31, %v498_v39  ;;  %v499_v43 = vshrl.u32 %v498_v39, 5 }
  0xe9   :  { %v501_v42 = vsub.s32 32, %v500_v40  ;;  %v503_v45 = vshll.u32 %v808_v44, %v500_v40  ;;  %v506_v47 = vshll.u32 %v809_v46, %v500_v40  ;;  %v509_v51 = vshll.u32 %v810_v49, %v500_v40 }
  0xea   :  { %v512_v54 = vshll.u32 %v811_v52, %v500_v40  ;;  %v515_v57 = vshll.u32 %v812_v55, %v500_v40  ;;  %vm518_vm4 = vcmp.lt.s32.totalorder %v499_v43, 1  ;;  %vm521_vm5 = vcmp.lt.s32.totalorder %v499_v43, 4 }
  0xeb   :  { %v504_v48 = vshrl.u32 %v809_v46, %v501_v42  ;;  %v507_v50 = vshrl.u32 %v810_v49, %v501_v42  ;;  %v510_v53 = vshrl.u32 %v811_v52, %v501_v42  ;;  %v513_v56 = vshrl.u32 %v812_v55, %v501_v42 }
  0xec   :  { %v516_v59 = vshrl.u32 %v813_v58, %v501_v42  ;;  %v502_v5 = vshrl.u32 %v808_v44, %v501_v42  ;;  %vm520_vm6 = vcmp.lt.s32.totalorder %v499_v43, 3  ;;  %vm519_vm7 = vcmp.lt.s32.totalorder %v499_v43, 2 }
  0xed   :  { %v505_v61 = vor.u32 %v504_v48, %v503_v45  ;;  %v508_v62 = vor.u32 %v507_v50, %v506_v47  ;;  %v511_v63 = vor.u32 %v510_v53, %v509_v51  ;;  %v514_v0 = vor.u32 %v513_v56, %v512_v54  ;;  %v484_v53 = vld [vmem:[%s887_s3] sm:$0x1]  ;;  %s815_s3 = smov [#allocation2]  }
  0xee   :  { %v517_v1 = vor.u32 %v516_v59, %v515_v57  ;;  %v694_v51 = vlaneseq  ;;  %vm485_vm12 = vcmp.gt.f32.partialorder %v484_v53, 0.5  ;;  %v814_v58 = vmov 0   ;;  %s707_s20 = sshll.u32 %s815_s3, 4  ;;  %s708_s20 = int_to_ptr.vmem [resolvable:$true] %s707_s20 }
  0xef   :  { %v523_v2 = vsel %vm521_vm5, %v511_v63, 2102212464  ;;  %v526_v3 = vsel %vm518_vm4, %v505_v61, %v508_v62  ;;  %v530_v4 = vsel %vm518_vm4, %v508_v62, %v511_v63  ;;  %v527_v6 = vsel %vm521_vm5, %v514_v0, 920167782  ;;  %s784_s21 = scalar_lea.vmem %s708_s20, 128  ;;  %p789_p1 = scmp.lt.s32.totalorder %s708_s20, %s708_s20 }
  0xf0   :  { %v531_v7 = vsel %vm521_vm5, %v517_v1, 1326507024  ;;  %v528_v8 = vsel %vm520_vm6, %v511_v63, %v527_v6  ;;  %v522_v11 = vsel %vm518_vm4, %v502_v5, %v505_v61  ;;  %v524_v12 = vsel %vm520_vm6, %v508_v62, %v523_v2  ;;  %p785_p0 = scmp.ne.s32.totalorder %s708_s20, %s784_s21  ;;  %p790_p2 = scmp.lt.s32.totalorder %s784_s21, %s784_s21 }
  0xf1   :  { %v532_v9 = vsel %vm520_vm6, %v514_v0, %v531_v7  ;;  %v529_v13 = vsel %vm519_vm7, %v526_v3, %v528_v8  ;;  %v525_v19 = vsel %vm519_vm7, %v522_v11, %v524_v12  ;;  %v695_v54 = vshrl.u32 %v694_v51, 7 }
  0xf2   :  { %v533_v14 = vsel %vm519_vm7, %v530_v4, %v532_v9  ;;  %v865_v17 = vmul.u32.u64.low %v534_v10, %v529_v13  ;;  %v866_v18 = vmul.u32.u64.high %v534_v10, %v529_v13, %v865_v17  ;;  %v541_v21 = vmul.u32 %v534_v10, %v525_v19  ;;  %p791_p3 = por %p790_p2, %p789_p1 }
  0xf3   :  { %v862_v15 = vmul.u32.u64.low %v534_v10, %v533_v14  ;;  %v863_v16 = vmul.u32.u64.high %v534_v10, %v533_v14, %v862_v15  ;;  %v696_v57 = vsub.s32 0, %v695_v54  ;;  %v693_v59 = vsel %vm485_vm12, 1, %v814_v58 }
  0xf4   :  { %v544_v20 = vadd.s32 1, %v866_v18  ;;  %vm578_vm4 = vweird.f32 %v856_v33  ;;  %p792_p4 = pnand %p791_p3, %p785_p0 }
  0xf5   :  { %vm543_vm8 = vc.u32 %v863_v16, %v865_v17  ;;  %v542_v34 = vadd.s32 %v865_v17, %v863_v16  ;;  %v697_v38 = vrot.slane %v693_v59, %v696_v57 }
  0xf6   :  { %v545_v22 = vsel %vm543_vm8, %v544_v20, %v866_v18 }
  0xf7   :  { %v546_v23 = vadd.s32 %v545_v22, %v541_v21  ;;  %vm698_vm15 = vcmp.eq.s32.totalorder %v697_v38, 1 }
  0xf9   :  { %v547_v24 = vadd.s32 536870912, %v546_v23 }
  0xfb   :  { %v548_v25 = vshrl.u32 %v547_v24, 30 }
  0xfd   :  { %v549_v26 = vshll.u32 %v548_v25, 30  ;;  %v572_v48 = vsub.s32 4, %v548_v25 }
  0xff   :  { %v550_v27 = vsub.s32 %v546_v23, %v549_v26  ;;  %v573_v52 = vsel %vm488_vm10, %v572_v48, %v548_v25 }
 0x100   :  { %v575_v55 = vsel %vm487_vm11, 0, %v573_v52 }
 0x101   :  { %v552_v28 = vsub.s32 0, %v550_v27  ;;  %v579_v56 = vadd.s32 3, %v575_v55  ;;  %v683_v61 = vand.u32 3, %v575_v55 }
 0x103   :  { %v717_v29 = vmin.u32 %v552_v28, %v550_v27  ;;  %v580_v60 = vand.u32 3, %v579_v56  ;;  %vm688_vm14 = vcmp.eq.s32.totalorder %v683_v61, 2  ;;  %vm685_vm1 = vcmp.eq.s32.totalorder %v683_v61, 0 }
 0x104   :  { %vm684_vm3 = vcmp.lt.s32.totalorder %v683_v61, 2 }
 0x105   :  { %v554_v30 = vclz %v717_v29  ;;  %vm585_vm13 = vcmp.eq.s32.totalorder %v580_v60, 2  ;;  %vm582_vm0 = vcmp.eq.s32.totalorder %v580_v60, 0  ;;  %vm581_vm2 = vcmp.lt.s32.totalorder %v580_v60, 2 }
 0x107   :  { %v718_v31 = vadd.s32 4294967294, %v554_v30 }
 0x109   :  { %vm719_vm9 = vcmp.lt.s32.totalorder %v718_v31, 0 }
 0x10a   :  { %v557_v32 = vsel %vm719_vm9, 0, %v718_v31 }
 0x10b   :  { %v558_v35 = vsub.s32 32, %v557_v32  ;;  %v562_v36 = vsub.s32 4294967266, %v557_v32  ;;  %v559_v37 = vshll.u32 %v550_v27, %v557_v32 }
 0x10d   :  { %v560_v39 = vshrl.u32 %v542_v34, %v558_v35  ;;  %v563_v40 = vadd.s32 127, %v562_v36 }
 0x10f   :  { %v561_v41 = vor.u32 %v560_v39, %v559_v37  ;;  %v564_v42 = vshll.u32 %v563_v40, 23 }
 0x111   :  { %v565_v43 = vor.u32 4788187, %v564_v42  ;;  %v568_v45 = vcvt.s32.f32 %v561_v41 }
 0x113   :  { %v566_v44 = vand.u32 2147483647, %v565_v43 }
 0x115   :  { %v569_v46 = vmul.f32 %v568_v45, %v566_v44 }
 0x117   :  { %v570_v47 = vxor.u32 2147483648, %v569_v46 }
 0x119   :  { %v571_v49 = vsel %vm488_vm10, %v570_v47, %v569_v46 }
 0x11a   :  { %v574_v50 = vsel %vm487_vm11, %v856_v33, %v571_v49 }
 0x11b   :  { %780 = vcosq.f32 %v574_v50 }
 0x11c   :  { %782 = vsinq.f32 %v574_v50 }
 0x128   :  { %v781_v62 = vpop.eup %780 }
 0x129   :  { %v783_v63 = vpop.eup %782  ;;  %v586_v0 = vxor.u32 2147483648, %v781_v62 }
 0x12a   :  { %v583_v1 = vxor.u32 2147483648, %v783_v63 }
 0x12b   :  { %v587_v2 = vsel %vm585_vm13, %v586_v0, %v783_v63  ;;  %v690_v3 = vsel %vm688_vm14, %v586_v0, %v783_v63 }
 0x12c   :  { %v584_v4 = vsel %vm582_vm0, %v781_v62, %v583_v1  ;;  %v687_v5 = vsel %vm685_vm1, %v781_v62, %v583_v1 }
 0x12d   :  { %v588_v6 = vsel %vm581_vm2, %v584_v4, %v587_v2  ;;  %v691_v7 = vsel %vm684_vm3, %v687_v5, %v690_v3 }
 0x12e   :  { %v589_v8 = vsel %vm578_vm4, nan, %v588_v6  ;;  %v692_v9 = vsel %vm578_vm4, nan, %v691_v7 }
 0x12f   :  { %v699_v10 = vsel %vm698_vm15, %v589_v8, %v692_v9 }
 0x130   :  { %700 = vst [vmem:[#allocation2] sm:$0xff] %v699_v10 }
 0x131   :  { %795 = shalt.err (!%p792_p4)
}
 0x132   :  { %710 = dma.vmem_to_hbm [thread:$0]  %s708_s20, 128, %s888_s4, [#allocation3]  }
 0x133   :  { %804 = dma.done.wait [#allocation3], 128  }
 0x134   :  { %805 = vsyncadd [#allocation3], 4294967168 }
 0x135   :  { %714 = vsyncpa [#allocation3], 1 }

</bundles_post_ra>
